<compile_context>
chip_gen: v5e
topology: v5e:2x2
jax: 0.10.0
libtpu: 0.0.40
codegen_flags: <defaults>
</compile_context>

<pallas_src>
import functools

import jax
import jax.numpy as jnp
from jax.experimental import pallas as pl
from jax.experimental.pallas import tpu as pltpu

LANE = 128          # lane width; pad hidden/concat and output dims to this
BATCH_TILE = 128    # rows per grid step in the batched kernel


def _round_up(x, m):
    return ((x + m - 1) // m) * m


# ---------------------------------------------------------------------------
# Kernel body (shared by the single-sample and batched variants).
#   days_ref  : (R, 1)      per-row day scalar           (VMEM)
#   x_ref     : (R, D_in)   image features               (VMEM)
#   w1_ref    : (D_in, Hp)  fc1 weight, cols >= hidden are zero
#   b1_ref    : (1, Hp)     fc1 bias,   cols >= hidden are zero
#   oh_ref    : (1, Hp)     one-hot row, 1.0 at lane `hidden`
#   w2_ref    : (Hp, Op)    fc2 weight, rows >= hidden+1 and cols >= out are zero
#   b2_ref    : (1, Op)     fc2 bias,   cols >= out are zero
#   o_ref     : (R, Op)     sigmoid(fc2(cat)) -- lane-dense, sliced by wrapper
# ---------------------------------------------------------------------------
def _image_pred_kernel(days_ref, x_ref, w1_ref, b1_ref, oh_ref, w2_ref, b2_ref,
                       o_ref):
    # fc1 + ReLU at the padded concat width (padded lanes stay exactly 0).
    h = jnp.dot(x_ref[...], w1_ref[...], preferred_element_type=jnp.float32)
    h = jnp.maximum(h + b1_ref[...], 0.0)                       # (R, Hp)

    # torch.cat((h, [x_days])): splice each row's day into lane `hidden`
    # via a single FMA with the one-hot row (lane `hidden` of h is 0).
    cat = h + days_ref[...] * oh_ref[...]                       # (R, Hp)

    # fc2 + Sigmoid (zero-padded rows/cols of w2/b2 are inert).
    y = jnp.dot(cat, w2_ref[...], preferred_element_type=jnp.float32) + b2_ref[...]
    o_ref[...] = jax.nn.sigmoid(y)                              # (R, Op)


# ---------------------------------------------------------------------------
# Parameter packing (one-time): zero-pad to lane-dense shapes.
# ---------------------------------------------------------------------------
def pack_params(params, input_size, hidden_size, output_size):
    d_in = input_size - 1
    h_pad = _round_up(hidden_size + 1, LANE)
    o_pad = _round_up(output_size, LANE)
    w1, b1, w2, b2 = params["w1"], params["b1"], params["w2"], params["b2"]

    w1p = jnp.zeros((d_in, h_pad), jnp.float32).at[:, :hidden_size].set(w1)
    b1p = jnp.zeros((1, h_pad), jnp.float32).at[0, :hidden_size].set(b1)
    onehot = jnp.zeros((1, h_pad), jnp.float32).at[0, hidden_size].set(1.0)
    w2p = jnp.zeros((h_pad, o_pad), jnp.float32).at[:hidden_size + 1, :output_size].set(w2)
    b2p = jnp.zeros((1, o_pad), jnp.float32).at[0, :output_size].set(b2)
    return {"w1p": w1p, "b1p": b1p, "onehot": onehot, "w2p": w2p, "b2p": b2p}


# ---------------------------------------------------------------------------
# Single-sample forward (exact torch semantics: 1-D x_image, scalar x_days).
# ---------------------------------------------------------------------------
def make_image_prediction_fn(input_size, hidden_size, output_size):
    d_in = input_size - 1
    o_pad = _round_up(output_size, LANE)

    vmem = pl.BlockSpec(memory_space=pltpu.MemorySpace.VMEM)
    call = pl.pallas_call(
        _image_pred_kernel,
        out_shape=jax.ShapeDtypeStruct((1, o_pad), jnp.float32),
        in_specs=[vmem] * 7,
        out_specs=vmem,
    )

    @jax.jit
    def forward(x_image, x_days, packed):
        x_row = x_image.reshape(1, d_in).astype(jnp.float32)
        days = jnp.asarray(x_days, jnp.float32).reshape(1, 1)
        out = call(days, x_row, packed["w1p"], packed["b1p"], packed["onehot"],
                   packed["w2p"], packed["b2p"])
        return out[0, :output_size]              # torch output shape (output_size,)

    return forward


# ---------------------------------------------------------------------------
# Batched forward: grid over batch tiles, weights VMEM-resident across steps,
# batch axis "parallel" (v7x: both TensorCores active).
# ---------------------------------------------------------------------------
def make_batched_image_prediction_fn(input_size, hidden_size, output_size):
    d_in = input_size - 1
    h_pad = _round_up(hidden_size + 1, LANE)
    o_pad = _round_up(output_size, LANE)

    def _build_call(b_pad):
        grid_spec = pltpu.PrefetchScalarGridSpec(
            num_scalar_prefetch=0,
            grid=(b_pad // BATCH_TILE,),
            in_specs=[
                pl.BlockSpec((BATCH_TILE, 1), lambda i: (i, 0)),      # days
                pl.BlockSpec((BATCH_TILE, d_in), lambda i: (i, 0)),   # x
                pl.BlockSpec((d_in, h_pad), lambda i: (0, 0)),        # w1 (resident)
                pl.BlockSpec((1, h_pad), lambda i: (0, 0)),           # b1
                pl.BlockSpec((1, h_pad), lambda i: (0, 0)),           # one-hot
                pl.BlockSpec((h_pad, o_pad), lambda i: (0, 0)),       # w2
                pl.BlockSpec((1, o_pad), lambda i: (0, 0)),           # b2
            ],
            out_specs=pl.BlockSpec((BATCH_TILE, o_pad), lambda i: (i, 0)),
        )
        return pl.pallas_call(
            _image_pred_kernel,
            out_shape=jax.ShapeDtypeStruct((b_pad, o_pad), jnp.float32),
            grid_spec=grid_spec,
            compiler_params=pltpu.CompilerParams(
                dimension_semantics=("parallel",)),
        )

    @jax.jit
    def forward(x_images, x_days, packed):
        b = x_images.shape[0]
        b_pad = _round_up(b, BATCH_TILE)
        x = jnp.zeros((b_pad, d_in), jnp.float32).at[:b].set(
            x_images.astype(jnp.float32))
        d = jnp.zeros((b_pad, 1), jnp.float32).at[:b, 0].set(
            jnp.asarray(x_days, jnp.float32).reshape(b))
        out = _build_call(b_pad)(d, x, packed["w1p"], packed["b1p"],
                                 packed["onehot"], packed["w2p"], packed["b2p"])
        return out[:b, :output_size]

    return forward


# ---------------------------------------------------------------------------
# Init + pure-JAX reference.
# ---------------------------------------------------------------------------
def init_params(key, input_size, hidden_size, output_size):
    """nn.Linear-style init (uniform +-1/sqrt(fan_in)); weights stored
    as (in_features, out_features)."""
    k1, k2, k3, k4 = jax.random.split(key, 4)
    d_in = input_size - 1
    bound1 = 1.0 / jnp.sqrt(d_in)
    bound2 = 1.0 / jnp.sqrt(hidden_size + 1)
    return {
        "w1": jax.random.uniform(k1, (d_in, hidden_size), jnp.float32, -bound1, bound1),
        "b1": jax.random.uniform(k2, (hidden_size,), jnp.float32, -bound1, bound1),
        "w2": jax.random.uniform(k3, (hidden_size + 1, output_size), jnp.float32, -bound2, bound2),
        "b2": jax.random.uniform(k4, (output_size,), jnp.float32, -bound2, bound2),
    }


def reference_forward(x_image, x_days, params):
    h = jnp.maximum(x_image @ params["w1"] + params["b1"], 0.0)
    cat = jnp.concatenate([h, jnp.asarray(x_days, jnp.float32).reshape(1)], axis=0)
    return jax.nn.sigmoid(cat @ params["w2"] + params["b2"])


if __name__ == "__main__":
    input_size, hidden_size, output_size = 17, 32, 8   # x_image has 16 features
    key = jax.random.PRNGKey(0)
    kp, kx, kb, kd = jax.random.split(key, 4)

    params = init_params(kp, input_size, hidden_size, output_size)
    packed = pack_params(params, input_size, hidden_size, output_size)

    # --- single-sample path (matches torch forward exactly) ---
    forward = make_image_prediction_fn(input_size, hidden_size, output_size)
    x_image = jax.random.normal(kx, (input_size - 1,), jnp.float32)
    x_days = jnp.asarray(-3.0, jnp.float32)   # negative on purpose: must not be ReLU-clamped
    out = forward(x_image, x_days, packed)
    jax.block_until_ready(out)
    ref = reference_forward(x_image, x_days, params)
    assert out.shape == (output_size,)
    assert jnp.allclose(out, ref, atol=1e-5, rtol=1e-5), (out, ref)

    # --- batched path (amortizes launch / pipeline-step overhead) ---
    batched_forward = make_batched_image_prediction_fn(
        input_size, hidden_size, output_size)
    B = 256
    xb = jax.random.normal(kb, (B, input_size - 1), jnp.float32)
    db = jax.random.uniform(kd, (B,), jnp.float32, -5.0, 5.0)
    out_b = batched_forward(xb, db, packed)
    jax.block_until_ready(out_b)
    ref_b = jax.vmap(lambda xi, di: reference_forward(xi, di, params))(xb, db)
    assert out_b.shape == (B, output_size)
    assert jnp.allclose(out_b, ref_b, atol=1e-5, rtol=1e-5)

    print("KERNEL_OK")
</pallas_src>

<mosaic_0001>
module attributes {stable_mosaic.version = 11 : i64} {
  func.func @_image_pred_kernel(%arg0: memref<1x1xf32, #tpu.memory_space<vmem>>, %arg1: memref<1x16xf32, #tpu.memory_space<vmem>>, %arg2: memref<16x128xf32, #tpu.memory_space<vmem>>, %arg3: memref<1x128xf32, #tpu.memory_space<vmem>>, %arg4: memref<1x128xf32, #tpu.memory_space<vmem>>, %arg5: memref<128x128xf32, #tpu.memory_space<vmem>>, %arg6: memref<1x128xf32, #tpu.memory_space<vmem>>, %arg7: memref<1x128xf32, #tpu.memory_space<vmem>>) attributes {dimension_semantics = [], scalar_prefetch = 0 : i64, scratch_operands = 0 : i64, tpu.core_type = #tpu.core_type<tc>} {
    %c0 = arith.constant 0 : index
    %c0_0 = arith.constant 0 : index
    %0 = vector.load %arg1[%c0, %c0_0] : memref<1x16xf32, #tpu.memory_space<vmem>>, vector<1x16xf32>
    %c0_1 = arith.constant 0 : index
    %c0_2 = arith.constant 0 : index
    %1 = vector.load %arg2[%c0_1, %c0_2] : memref<16x128xf32, #tpu.memory_space<vmem>>, vector<16x128xf32>
    %cst = arith.constant dense<0.000000e+00> : vector<1x128xf32>
    %2 = tpu.matmul %0, %1, %cst {dimension_numbers = #tpu.dot_dimension_numbers<[1], [0], [0], [1], [0, 0, 1, 1], [], []>} : vector<1x16xf32>, vector<16x128xf32>, vector<1x128xf32> -> vector<1x128xf32>
    %c0_3 = arith.constant 0 : index
    %c0_4 = arith.constant 0 : index
    %3 = vector.load %arg3[%c0_3, %c0_4] : memref<1x128xf32, #tpu.memory_space<vmem>>, vector<1x128xf32>
    %4 = arith.addf %2, %3 : vector<1x128xf32>
    %cst_5 = arith.constant 0.000000e+00 : f32
    %5 = vector.broadcast %cst_5 : f32 to vector<1x128xf32>
    %6 = arith.maximumf %4, %5 : vector<1x128xf32>
    %c0_6 = arith.constant 0 : index
    %c0_7 = arith.constant 0 : index
    %7 = vector.load %arg0[%c0_6, %c0_7] : memref<1x1xf32, #tpu.memory_space<vmem>>, vector<1x1xf32>
    %c0_8 = arith.constant 0 : index
    %c0_9 = arith.constant 0 : index
    %8 = vector.load %arg4[%c0_8, %c0_9] : memref<1x128xf32, #tpu.memory_space<vmem>>, vector<1x128xf32>
    %9 = vector.broadcast %7 : vector<1x1xf32> to vector<1x128xf32>
    %10 = arith.mulf %9, %8 : vector<1x128xf32>
    %11 = arith.addf %6, %10 : vector<1x128xf32>
    %c0_10 = arith.constant 0 : index
    %c0_11 = arith.constant 0 : index
    %12 = vector.load %arg5[%c0_10, %c0_11] : memref<128x128xf32, #tpu.memory_space<vmem>>, vector<128x128xf32>
    %cst_12 = arith.constant dense<0.000000e+00> : vector<1x128xf32>
    %13 = tpu.matmul %11, %12, %cst_12 {dimension_numbers = #tpu.dot_dimension_numbers<[1], [0], [0], [1], [0, 0, 1, 1], [], []>} : vector<1x128xf32>, vector<128x128xf32>, vector<1x128xf32> -> vector<1x128xf32>
    %c0_13 = arith.constant 0 : index
    %c0_14 = arith.constant 0 : index
    %14 = vector.load %arg6[%c0_13, %c0_14] : memref<1x128xf32, #tpu.memory_space<vmem>>, vector<1x128xf32>
    %15 = arith.addf %13, %14 : vector<1x128xf32>
    %16 = arith.negf %15 : vector<1x128xf32>
    %17 = math.exp %16 : vector<1x128xf32>
    %cst_15 = arith.constant 1.000000e+00 : f32
    %18 = vector.broadcast %cst_15 : f32 to vector<1x128xf32>
    %19 = arith.addf %18, %17 : vector<1x128xf32>
    %20 = arith.divf %18, %19 : vector<1x128xf32>
    %c0_16 = arith.constant 0 : index
    %c0_17 = arith.constant 0 : index
    %21 = vector.load %arg7[%c0_16, %c0_17] : memref<1x128xf32, #tpu.memory_space<vmem>>, vector<1x128xf32>
    tpu.vector_store %arg7[%c0_16, %c0_17], %20 {strides = array<i32>} : memref<1x128xf32, #tpu.memory_space<vmem>>, vector<1x128xf32>,
    return
  }
}

</mosaic_0001>

<bundles_post_ra>
// kernel: forward.1
= control target key start
LH: loop header
LB: loop body
LE: loop exit
PB: predicated region body
PF: predicated region fallthrough
CT: control target
= control target key end

     0   :  { %s295_s0 = inlined_call_operand.<no memory space> [shape: f32[1,1], index: 0, kind: input, shape index: {}]   ;;  %s296_s1 = inlined_call_operand.vmem [shape: f32[1,16], index: 1, kind: input, shape index: {}]   ;;  %s297_s2 = inlined_call_operand.hbm [shape: f32[16,128], index: 2, kind: input, shape index: {}]   ;;  %s298_s3 = inlined_call_operand.vmem [shape: f32[1,128], index: 3, kind: input, shape index: {}]   ;;  %s299_s4 = inlined_call_operand.vmem [shape: f32[1,128], index: 4, kind: input, shape index: {}]   ;;  %s300_s5 = inlined_call_operand.hbm [shape: f32[128,128], index: 5, kind: input, shape index: {}]   ;;  %s301_s6 = inlined_call_operand.vmem [shape: f32[1,128], index: 6, kind: input, shape index: {}]   ;;  %s302_s7 = inlined_call_operand.vmem [shape: f32[1,128], index: 7, kind: output, shape index: {}]  }
   0x1   :  { %v12_v0 = vstv %s295_s0 }
   0x2   :  { %13 = vst [vmem:[#allocation2] sm:$0x1] %v12_v0 }
   0x3   :  { %14 = vsyncpa [#allocation4], 0  ;;  %s24_s28 = sshll.u32 %s297_s2, 4  ;;  %s25_s28 = int_to_ptr.hbm [resolvable:$true] %s24_s28 }
   0x4   :  { %15 = vsyncpa [#allocation6], 0  ;;  %s226_s29 = smov [#allocation3]   ;;  %s41_s10 = sshll.u32 %s300_s5, 4  ;;  %s42_s10 = int_to_ptr.hbm [resolvable:$true] %s41_s10 }
   0x5   :  { %s26_s30 = sshll.u32 %s226_s29, 4  ;;  %s227_s11 = smov 128   ;;  %s27_s30 = int_to_ptr.vmem [resolvable:$true] %s26_s30 }
   0x6   :  { %s228_s12 = smov 8   ;;  %s229_s0 = smov [#allocation5]  }
   0x7   :  { %32 = dma.hbm_to_vmem [thread:$0]  %s25_s28, 256, %s27_s30, [#allocation4], %s227_s11, %s227_s11, %s228_s12  }
   0x8   :  { %s43_s13 = sshll.u32 %s229_s0, 4  ;;  %s44_s13 = int_to_ptr.vmem [resolvable:$true] %s43_s13 }
   0x9   :  { %49 = dma.hbm_to_vmem [thread:$0]  %s42_s10, 2048, %s44_s13, [#allocation6], %s227_s11, %s227_s11, %s228_s12  }
   0xa   :  { %222 = dma.done.wait [#allocation4], 256  }
   0xb   :  { %223 = vsyncadd [#allocation4], 4294967040 }
   0xc   :  { %224 = dma.done.wait [#allocation6], 2048  }
   0xd   :  { %225 = vsyncadd [#allocation6], 4294965248  ;;  %v230_v1 = vmov 0   ;;  %v62_v2 = vld [vmem:[#allocation3 + $0x8] sm:$0xff]  ;;  %v61_v3 = vld [vmem:[#allocation3] sm:$0xff]  ;;  %vm64_vm0 = vcmask 130048  }
   0xe   :  { %169 = vset.pattern.permute.xlu0 %v230_v1  ;;  %v60_v4 = vld [vmem:[%s296_s1] sm:$0x1]  ;;  %82 = vmatpush.msra.mxu0 %v62_v2  ;;  %v114_v6 = vld [vmem:[#allocation5 + $0x78] sm:$0xff]  ;;  %v113_v7 = vld [vmem:[#allocation5 + $0x70] sm:$0xff] }
   0xf   :  { %v89_v5 = vld [vmem:[#allocation2] sm:$0x1]  ;;  %116 = vmatpush.msra.mxu1 %v114_v6  ;;  %v111_v9 = vld [vmem:[#allocation5 + $0x60] sm:$0xff]  ;;  %v110_v10 = vld [vmem:[#allocation5 + $0x58] sm:$0xff] }
  0x10   :  { %93 = vperm.xlu0 %169, %v89_v5   ;;  %83 = vmatpush.msra.mxu0 %v61_v3  ;;  %v112_v8 = vld [vmem:[#allocation5 + $0x68] sm:$0xff]  ;;  %v109_v11 = vld [vmem:[#allocation5 + $0x50] sm:$0xff]  ;;  %v107_v13 = vld [vmem:[#allocation5 + $0x40] sm:$0xff] }
  0x11   :  { %162 = vmatmul.msk.f32.vlgmr.msra.gmra.mxu0 %vm64_vm0, %v60_v4  ;;  %117 = vmatpush.msra.mxu1 %v113_v7  ;;  %v108_v12 = vld [vmem:[#allocation5 + $0x48] sm:$0xff]  ;;  %v106_v14 = vld [vmem:[#allocation5 + $0x38] sm:$0xff]  ;;  %v105_v15 = vld [vmem:[#allocation5 + $0x30] sm:$0xff] }
  0x12   :  { %v104_v16 = vld [vmem:[#allocation5 + $0x28] sm:$0xff]  ;;  %v103_v17 = vld [vmem:[#allocation5 + $0x20] sm:$0xff]  ;;  %v102_v18 = vld [vmem:[#allocation5 + $0x18] sm:$0xff] }
  0x13   :  { %118 = vmatpush.msra.mxu1 %v112_v8  ;;  %v101_v19 = vld [vmem:[#allocation5 + $0x10] sm:$0xff]  ;;  %v100_v20 = vld [vmem:[#allocation5 + $0x8] sm:$0xff]  ;;  %v99_v21 = vld [vmem:[#allocation5] sm:$0xff] }
  0x14   :  { %v90_v24 = vld [vmem:[%s299_s4] sm:$0x1] }
  0x15   :  { %119 = vmatpush.msra.mxu1 %v111_v9  ;;  %v63_v25 = vld [vmem:[%s298_s3] sm:$0x1] }
  0x16   :  { %v115_v31 = vld [vmem:[%s301_s6] sm:$0x1] }
  0x17   :  { %120 = vmatpush.msra.mxu1 %v110_v10 }
  0x19   :  { %121 = vmatpush.msra.mxu1 %v109_v11 }
  0x1b   :  { %122 = vmatpush.msra.mxu1 %v108_v12 }
  0x1d   :  { %123 = vmatpush.msra.mxu1 %v107_v13 }
  0x1f   :  { %124 = vmatpush.msra.mxu1 %v106_v14 }
  0x21   :  { %125 = vmatpush.msra.mxu1 %v105_v15 }
  0x23   :  { %126 = vmatpush.msra.mxu1 %v104_v16 }
  0x25   :  { %127 = vmatpush.msra.mxu1 %v103_v17 }
  0x27   :  { %128 = vmatpush.msra.mxu1 %v102_v18 }
  0x29   :  { %129 = vmatpush.msra.mxu1 %v101_v19 }
  0x2b   :  { %130 = vmatpush.msra.mxu1 %v100_v20 }
  0x2d   :  { %131 = vmatpush.msra.mxu1 %v99_v21 }
  0x82   :  { %v94_v22 = vpop.permute.xlu0 %93 }
  0x83   :  { %v96_v23 = vperm.slane %v94_v22, 0 }
  0x85   :  { %v97_v27 = vmul.f32 %v96_v23, %v90_v24 }
  0x8e   :  { %v85_v26 = vpop.f32.mrf.mxu0 }
  0x8f   :  { %v86_v28 = vadd.f32 %v85_v26, %v63_v25 }
  0x91   :  { %v88_v29 = vmax.f32 %v86_v28, 0.0 }
  0x93   :  { %v98_v30 = vadd.f32 %v97_v27, %v88_v29 }
  0x95   :  { %132 = vmatmul.f32.vlgmr.msra.gmra.mxu1 %v98_v30 }
 0x112   :  { %v133_v32 = vpop.f32.mrf.mxu1 }
 0x113   :  { %v134_v33 = vadd.f32 %v133_v32, %v115_v31 }
 0x115   :  { %v163_v34 = vmul.f32 -1.442695, %v134_v33 }
 0x117   :  { %170 = vpow2.f32 %v163_v34 }
 0x11d   :  { %v171_v35 = vpop.eup %170 }
 0x11e   :  { %v139_v36 = vadd.f32 1.0, %v171_v35 }
 0x120   :  { %172 = vrcp.f32 %v139_v36  ;;  %v151_v40 = vand.u32 2147483648, %v139_v36  ;;  %v149_v42 = vand.u32 2147483647, %v139_v36  ;;  %vm145_vm2 = vweird.f32 %v139_v36 }
 0x122   :  { %v152_v44 = vor.u32 1.1754944e-38, %v151_v40  ;;  %vm150_vm4 = vcmp.eq.f32.partialorder %v149_v42, 8.507059e+37 }
 0x126   :  { %v173_v37 = vpop.eup %172 }
 0x127   :  { %v141_v38 = vmul.f32 %v173_v37, %v139_v36  ;;  %vm146_vm1 = vweird.f32 %v173_v37 }
 0x128   :  { %vm147_vm3 = vmor %vm145_vm2, %vm146_vm1 }
 0x129   :  { %v142_v39 = vsub.f32 1.0, %v141_v38 }
 0x12b   :  { %v143_v41 = vmul.f32 %v173_v37, %v142_v39 }
 0x12d   :  { %v144_v43 = vadd.f32 %v173_v37, %v143_v41 }
 0x12f   :  { %v148_v45 = vsel %vm147_vm3, %v173_v37, %v144_v43 }
 0x130   :  { %v153_v46 = vsel %vm150_vm4, %v152_v44, %v148_v45 }
 0x131   :  { %155 = vst [vmem:[%s302_s7] sm:$0x1] %v153_v46 }
 0x132   :  { %160 = vsyncpa [#allocation4], 1 }
 0x133   :  { %161 = vsyncpa [#allocation6], 1 }

</bundles_post_ra>
